<compile_context>
chip_gen: v7x
topology: tpu7x:2x2x1
jax: 0.10.0
libtpu: 0.0.40
codegen_flags: <defaults>
</compile_context>

<pallas_src>
import functools
import math

import jax
import jax.numpy as jnp
from jax import lax
from jax.experimental import pallas as pl
from jax.experimental.pallas import tpu as pltpu

LANE = 128   # fast (lane) axis
SUB = 8      # sublane rows of the f32 vector accumulator


@functools.lru_cache(maxsize=1)
def _chip_config():
    """(generation, max_block_rows_f32, usable_cores, use_bf16_softplus)."""
    kind = ""
    try:
        kind = (getattr(jax.devices()[0], "device_kind", "") or "").lower()
    except Exception:
        pass
    gen = 0
    for g in (7, 6, 5, 4):
        if f"v{g}" in kind:
            gen = g
            break
    if gen >= 7:
        max_block_rows, num_cores = 8192, 2      # 4 MiB/input/buffer, 2 TCs
    elif gen == 6:
        max_block_rows, num_cores = 4096, 1
    else:
        max_block_rows, num_cores = 2048, 1
    # bf16 EUP softplus only pays on v7x (bce is EUP-bound at 3.2 TB/s HBM);
    # v5e has no bf16 EUP/VPU, v6e is ~neutral -> keep f32 there.
    return gen, max_block_rows, num_cores, gen >= 7


def _pad_values(loss_type: str):
    """Loss-neutral pad values: padded elements contribute exactly 0 to the sum."""
    if loss_type == "wgan-gp":
        return 0.0, 0.0
    if loss_type == "lsgan":
        return 1.0, 0.0          # (1-1)^2 = 0, 0^2 = 0
    return 1e4, -1e4             # softplus(-1e4) == 0 exactly in f32 (and bf16)


def _make_kernel(loss_type, *, block_rows, steps, n_rows, exact, use_bf16_softplus):
    """Build the reduction kernel (all shape/loss params are static)."""

    def term_of(real_raw, fake_raw):
        real = real_raw.astype(jnp.float32)
        fake = fake_raw.astype(jnp.float32)
        if loss_type == "wgan-gp":
            return fake - real
        if loss_type == "lsgan":
            r = real - 1.0
            return r * r + fake * fake
        # bce-with-logits vs targets 1 (real) / 0 (fake)
        if use_bf16_softplus:
            r_sp = jax.nn.softplus((-real_raw).astype(jnp.bfloat16)).astype(jnp.float32)
            f_sp = jax.nn.softplus(fake_raw.astype(jnp.bfloat16)).astype(jnp.float32)
            return r_sp + f_sp
        return jax.nn.softplus(-real) + jax.nn.softplus(fake)

    def kernel(real_ref, fake_ref, out_ref, acc_ref):
        p = pl.program_id(0)
        i = pl.program_id(1)

        @pl.when(i == 0)
        def _init():
            acc_ref[...] = jnp.zeros_like(acc_ref)

        def fold(masked):
            term = term_of(real_ref[...], fake_ref[...])
            if masked:
                # Zero out rows past the array end (partial edge block) and all rows
                # of duplicate blocks produced by the clamped index map.
                row0 = (p * steps + i) * block_rows
                rows = row0 + lax.broadcasted_iota(jnp.int32, term.shape, 0)
                term = jnp.where(rows < n_rows, term, 0.0)
            # (block_rows, 128) -> (8, 128): pure VPU adds every step; the single
            # cross-lane reduce happens once in the epilogue.
            acc_ref[...] += jnp.sum(term.reshape(-1, SUB, LANE), axis=0)

        if exact:
            fold(False)                    # grid tiles the array exactly: no mask code
        else:
            needs_mask = (p * steps + i + 1) * block_rows > n_rows

            @pl.when(jnp.logical_not(needs_mask))
            def _full():
                fold(False)

            @pl.when(needs_mask)
            def _boundary():
                fold(True)

        @pl.when(i == steps - 1)
        def _finalize():
            out_ref[0, 0] = jnp.sum(acc_ref[...])

    return kernel


def discriminator_loss(real_logits, fake_logits, loss_type: str = "wgan-gp"):
    """Pallas TPU implementation of DiscriminatorLoss.forward."""
    assert real_logits.shape == fake_logits.shape, "expect matching logit shapes"
    n_valid = int(math.prod(real_logits.shape))
    assert n_valid > 0

    _, max_block_rows, num_cores, use_bf16_sp = _chip_config()

    item_r = jnp.dtype(real_logits.dtype).itemsize
    item_f = jnp.dtype(fake_logits.dtype).itemsize
    # Native sublane packing: 8 for f32, 16 for bf16, 32 for 8-bit dtypes.
    packing = max(8, 8 * (4 // max(item_r, 1)), 8 * (4 // max(item_f, 1)))
    # Keep bytes/step roughly constant for narrow dtypes.
    max_rows = max_block_rows * max(1, 4 // max(item_r, item_f, 1))

    n_rows_data = pl.cdiv(n_valid, LANE)
    rows = pl.cdiv(n_rows_data, packing) * packing   # round rows up to the min tile

    # 2-way core split only on v7x and only if each core gets >= 1 full max block.
    num_splits = num_cores if (num_cores > 1 and rows >= 2 * max_rows) else 1
    rows_per_split = pl.cdiv(rows, num_splits)
    block_rows = max(packing, min(max_rows, pl.cdiv(rows_per_split, packing) * packing))
    steps = pl.cdiv(rows_per_split, block_rows)
    exact = (num_splits * steps * block_rows == rows)
    last_blk = pl.cdiv(rows, block_rows) - 1

    pad_r, pad_f = _pad_values(loss_type)

    def prep(x, pad_val):
        flat = x.reshape(-1)                       # free for contiguous inputs
        need = rows * LANE
        if need != n_valid:                        # at most (packing*128 - 1) elements
            flat = jnp.pad(flat, (0, need - n_valid),
                           constant_values=jnp.asarray(pad_val, dtype=flat.dtype))
        return flat.reshape(rows, LANE)

    real2d = prep(real_logits, pad_r)
    fake2d = prep(fake_logits, pad_f)

    kernel = _make_kernel(loss_type, block_rows=block_rows, steps=steps,
                          n_rows=rows, exact=exact, use_bf16_softplus=use_bf16_sp)

    # Clamp the block index so a (rare) fully-out-of-range block re-reads the last real
    # block; its contribution is fully masked in-kernel, so no OOB DMA and no bias.
    def in_map(p, i):
        return (jnp.minimum(p * steps + i, last_blk), 0)

    block_bytes = block_rows * LANE * (item_r + item_f)     # both inputs, one buffer
    io_bytes = 2 * block_bytes                               # double-buffered
    vmem_limit = int(min(48 << 20, max(24 << 20, 2 * io_bytes + (4 << 20))))

    if num_splits > 1:
        dim_sem = (getattr(pltpu, "CORE_PARALLEL", "parallel"),
                   getattr(pltpu, "ARBITRARY", "arbitrary"))
    else:
        dim_sem = ("arbitrary", "arbitrary")

    partials = pl.pallas_call(
        kernel,
        out_shape=jax.ShapeDtypeStruct((num_splits, 1), jnp.float32),
        grid_spec=pltpu.PrefetchScalarGridSpec(
            num_scalar_prefetch=0,
            grid=(num_splits, steps),
            in_specs=[
                pl.BlockSpec((block_rows, LANE), in_map),
                pl.BlockSpec((block_rows, LANE), in_map),
            ],
            out_specs=pl.BlockSpec((1, 1), lambda p, i: (p, 0),
                                   memory_space=pltpu.SMEM),
            scratch_shapes=[pltpu.VMEM((SUB, LANE), jnp.float32)],
        ),
        compiler_params=pltpu.CompilerParams(
            dimension_semantics=dim_sem,
            vmem_limit_bytes=vmem_limit,
            allow_input_fusion=[True, True],
        ),
    )(real2d, fake2d)

    total = jnp.sum(partials)                 # (num_splits, 1) partial sums -> scalar
    inv_n = jnp.float32(1.0 / n_valid)
    if loss_type == "wgan-gp":
        return total * inv_n                  # mean(fake) - mean(real)
    return total * (0.5 * inv_n)              # (real_loss + fake_loss) / 2


def _reference(real, fake, loss_type):
    real = real.astype(jnp.float32)
    fake = fake.astype(jnp.float32)
    if loss_type == "wgan-gp":
        return jnp.mean(fake) - jnp.mean(real)
    elif loss_type == "lsgan":
        return (jnp.mean((real - 1.0) ** 2) + jnp.mean(fake ** 2)) / 2.0
    else:
        return (jnp.mean(jax.nn.softplus(-real)) + jnp.mean(jax.nn.softplus(fake))) / 2.0


if __name__ == "__main__":
    key = jax.random.PRNGKey(0)
    k1, k2 = jax.random.split(key)
    # Patch-discriminator style logits: NCHW (2, 1, 16, 16)
    real_logits = jax.random.normal(k1, (2, 1, 16, 16), dtype=jnp.float32) + 0.5
    fake_logits = jax.random.normal(k2, (2, 1, 16, 16), dtype=jnp.float32) - 0.5

    _, _, _, _use_bf16_sp = _chip_config()
    ok = True
    for lt in ("wgan-gp", "lsgan", "bce"):
        out = jax.block_until_ready(discriminator_loss(real_logits, fake_logits, loss_type=lt))
        ref = _reference(real_logits, fake_logits, lt)
        # bf16 softplus (v7x-only fast path) relaxes the bce tolerance slightly.
        tol = 3e-3 if (lt == "bce" and _use_bf16_sp) else 1e-5
        if not jnp.allclose(out, ref, atol=tol, rtol=tol):
            ok = False
            print(f"MISMATCH for {lt}: kernel={out} ref={ref}")

    if ok:
        print("KERNEL_OK")
</pallas_src>

<mosaic_0001>
module attributes {stable_mosaic.version = 11 : i64} {
  func.func @kernel(%arg0: i32, %arg1: i32, %arg2: memref<8x128xf32, #tpu.memory_space<vmem>>, %arg3: memref<8x128xf32, #tpu.memory_space<vmem>>, %arg4: memref<1x1xf32, #tpu.memory_space<smem>>, %arg5: memref<8x128xf32, #tpu.memory_space<vmem>>) attributes {dimension_semantics = [#tpu.dimension_semantics<arbitrary>, #tpu.dimension_semantics<arbitrary>], iteration_bounds = array<i64: 1, 1>, scalar_prefetch = 0 : i64, scratch_operands = 1 : i64, tpu.core_type = #tpu.core_type<tc>, window_params = [{transform_indices = @transform_0, window_bounds = array<i64: 8, 128>}, {transform_indices = @transform_1, window_bounds = array<i64: 8, 128>}, {transform_indices = @transform_2, window_bounds = array<i64: 1, 1>}]} {
    %c0_i32 = arith.constant 0 : i32
    %0 = arith.cmpi eq, %arg1, %c0_i32 : i32
    %1 = arith.extui %0 : i1 to i32
    %c0_i32_0 = arith.constant 0 : i32
    %2 = arith.cmpi ne, %1, %c0_i32_0 : i32
    scf.if %2 {
      %cst_10 = arith.constant 0.000000e+00 : f32
      %14 = vector.broadcast %cst_10 : f32 to vector<8x128xf32>
      %c0_11 = arith.constant 0 : index
      %c0_12 = arith.constant 0 : index
      %15 = vector.load %arg5[%c0_11, %c0_12] : memref<8x128xf32, #tpu.memory_space<vmem>>, vector<8x128xf32>
      tpu.vector_store %arg5[%c0_11, %c0_12], %14 {strides = array<i32>} : memref<8x128xf32, #tpu.memory_space<vmem>>, vector<8x128xf32>,
    } else {
    }
    %c0 = arith.constant 0 : index
    %c0_1 = arith.constant 0 : index
    %3 = vector.load %arg2[%c0, %c0_1] : memref<8x128xf32, #tpu.memory_space<vmem>>, vector<8x128xf32>
    %c0_2 = arith.constant 0 : index
    %c0_3 = arith.constant 0 : index
    %4 = vector.load %arg3[%c0_2, %c0_3] : memref<8x128xf32, #tpu.memory_space<vmem>>, vector<8x128xf32>
    %5 = arith.subf %4, %3 : vector<8x128xf32>
    %c0_4 = arith.constant 0 : index
    %c0_5 = arith.constant 0 : index
    %6 = vector.load %arg5[%c0_4, %c0_5] : memref<8x128xf32, #tpu.memory_space<vmem>>, vector<8x128xf32>
    %7 = vector.shape_cast %5 : vector<8x128xf32> to vector<1x8x128xf32>
    %cst = arith.constant dense<0.000000e+00> : vector<8x128xf32>
    %8 = vector.multi_reduction <add>, %7, %cst [0] : vector<1x8x128xf32> to vector<8x128xf32>
    %9 = arith.addf %6, %8 : vector<8x128xf32>
    %c0_6 = arith.constant 0 : index
    %c0_7 = arith.constant 0 : index
    %10 = vector.load %arg5[%c0_6, %c0_7] : memref<8x128xf32, #tpu.memory_space<vmem>>, vector<8x128xf32>
    tpu.vector_store %arg5[%c0_6, %c0_7], %9 {strides = array<i32>} : memref<8x128xf32, #tpu.memory_space<vmem>>, vector<8x128xf32>,
    %c0_i32_8 = arith.constant 0 : i32
    %11 = arith.cmpi eq, %arg1, %c0_i32_8 : i32
    %12 = arith.extui %11 : i1 to i32
    %c0_i32_9 = arith.constant 0 : i32
    %13 = arith.cmpi ne, %12, %c0_i32_9 : i32
    scf.if %13 {
      %c0_10 = arith.constant 0 : index
      %c0_11 = arith.constant 0 : index
      %14 = vector.load %arg5[%c0_10, %c0_11] : memref<8x128xf32, #tpu.memory_space<vmem>>, vector<8x128xf32>
      %15 = vector.shape_cast %14 : vector<8x128xf32> to vector<1x8x128xf32>
      %cst_12 = arith.constant dense<0.000000e+00> : vector<1xf32>
      %16 = vector.multi_reduction <add>, %15, %cst_12 [1, 2] : vector<1x8x128xf32> to vector<1xf32>
      %17 = vector.shape_cast %16 : vector<1xf32> to vector<1x1x1xf32>
      %18 = vector.extract %17[0, 0, 0] : f32 from vector<1x1x1xf32>
      %c0_13 = arith.constant 0 : index
      %c0_14 = arith.constant 0 : index
      %19 = memref.load %arg4[%c0_13, %c0_14] : memref<1x1xf32, #tpu.memory_space<smem>>
      memref.store %18, %arg4[%c0_13, %c0_14] : memref<1x1xf32, #tpu.memory_space<smem>>
    } else {
    }
    return
  }
  func.func @transform_0(%arg0: i32, %arg1: i32) -> (i32, i32) {
    %c1_i32 = arith.constant 1 : i32
    %0 = arith.muli %arg0, %c1_i32 : i32
    %1 = arith.addi %0, %arg1 : i32
    %c0_i32 = arith.constant 0 : i32
    %2 = arith.minsi %1, %c0_i32 : i32
    %c0_i32_0 = arith.constant 0 : i32
    %c0_i32_1 = arith.constant 0 : i32
    return %2, %c0_i32_0 : i32, i32
  }
  func.func @transform_1(%arg0: i32, %arg1: i32) -> (i32, i32) {
    %c1_i32 = arith.constant 1 : i32
    %0 = arith.muli %arg0, %c1_i32 : i32
    %1 = arith.addi %0, %arg1 : i32
    %c0_i32 = arith.constant 0 : i32
    %2 = arith.minsi %1, %c0_i32 : i32
    %c0_i32_0 = arith.constant 0 : i32
    %c0_i32_1 = arith.constant 0 : i32
    return %2, %c0_i32_0 : i32, i32
  }
  func.func @transform_2(%arg0: i32, %arg1: i32) -> (i32, i32) {
    %c0_i32 = arith.constant 0 : i32
    %c0_i32_0 = arith.constant 0 : i32
    return %arg0, %c0_i32 : i32, i32
  }
}

</mosaic_0001>

<bundles_post_ra>
// kernel: tpu_custom_call.1
= control target key start
LH: loop header
LB: loop body
LE: loop exit
PB: predicated region body
PF: predicated region fallthrough
CT: control target
= control target key end

     0   :  { %7 = vsyncpa [#allocation4], 0  ;;  %s217_s0 = inlined_call_operand.hbm [shape: f32[8,128], index: 0, kind: input, shape index: {}]   ;;  %s218_s1 = inlined_call_operand.hbm [shape: f32[8,128], index: 1, kind: input, shape index: {}]   ;;  %s219_s2 = inlined_call_operand.hbm [shape: f32[1,1], index: 2, kind: output, shape index: {}]  }
   0x1   :  { %8 = vsyncpa [#allocation7], 0 }
   0x2   :  { %9 = vsyncpa [#allocation5], 0  ;;  %s163_s9 = smov [#allocation3]   ;;  %s164_s11 = smov [#allocation6]  }
   0x3   :  { %s21_s10 = sshll.u32 %s163_s9, 4  ;;  %s36_s12 = sshll.u32 %s164_s11, 4  ;;  %s22_s10 = int_to_ptr.vmem [resolvable:$true] %s21_s10  ;;  %s37_s12 = int_to_ptr.vmem [resolvable:$true] %s36_s12 }
   0x4   :  { %s103_s15 = scalar_lea.hbm %s217_s0, 128 }
   0x5   :  { %p104_p0 = scmp.ne.s32.totalorder %s217_s0, %s103_s15  ;;  %p107_p1 = scmp.lt.u32.totalorder %s103_s15, %s217_s0 }
   0x7   :  { %p109_p2 = pnand %p107_p1, %p104_p0 }
   0x9   :  { %112 = shalt.err (!%p109_p2)
}
   0xa   :  { %s113_s20 = scalar_lea.vmem %s22_s10, 128  ;;  %p118_p4 = scmp.lt.s32.totalorder %s22_s10, %s22_s10 }
   0xb   :  { %p114_p3 = scmp.ne.s32.totalorder %s22_s10, %s113_s20  ;;  %p119_p5 = scmp.lt.s32.totalorder %s113_s20, %s113_s20 }
   0xd   :  { %p120_p6 = por %p119_p5, %p118_p4 }
   0xf   :  { %p121_p7 = pnand %p120_p6, %p114_p3 }
  0x11   :  { %124 = shalt.err (!%p121_p7)
}
  0x12   :  { %24 = dma.hbm_to_vmem [thread:$0]  %s217_s0, 128, %s22_s10, [#allocation4]  }
  0x13   :  { %s125_s25 = scalar_lea.hbm %s218_s1, 128 }
  0x14   :  { %p126_p8 = scmp.ne.s32.totalorder %s218_s1, %s125_s25  ;;  %p129_p9 = scmp.lt.u32.totalorder %s125_s25, %s218_s1 }
  0x16   :  { %p131_p10 = pnand %p129_p9, %p126_p8 }
  0x18   :  { %134 = shalt.err (!%p131_p10)
}
  0x19   :  { %s135_s30 = scalar_lea.vmem %s37_s12, 128  ;;  %p140_p12 = scmp.lt.s32.totalorder %s37_s12, %s37_s12 }
  0x1a   :  { %p136_p11 = scmp.ne.s32.totalorder %s37_s12, %s135_s30  ;;  %p141_p13 = scmp.lt.s32.totalorder %s135_s30, %s135_s30 }
  0x1c   :  { %p142_p0 = por %p141_p13, %p140_p12 }
  0x1e   :  { %p143_p1 = pnand %p142_p0, %p136_p11 }
  0x20   :  { %146 = shalt.err (!%p143_p1)
}
  0x21   :  { %39 = dma.hbm_to_vmem [thread:$0]  %s218_s1, 128, %s37_s12, [#allocation7]  }
  0x22   :  { %157 = dma.done.wait [#allocation4], 128  }
  0x23   :  { %158 = vsyncadd [#allocation4], 4294967168 }
  0x24   :  { %159 = dma.done.wait [#allocation7], 128  }
  0x25   :  { %160 = vsyncadd [#allocation7], 4294967168  ;;  %v57_v0 = vld [vmem:[#allocation3] sm:$0xff]  ;;  %v58_v1 = vld [vmem:[#allocation6] sm:$0xff]  ;;  %s147_s6 = scalar_lea.hbm %s219_s2, 16 }
  0x26   :  { %v59_v2 = vsub.f32 %v58_v1, %v57_v0  ;;  %p148_p2 = scmp.ne.s32.totalorder %s219_s2, %s147_s6  ;;  %p151_p3 = scmp.lt.u32.totalorder %s147_s6, %s219_s2 }
  0x28   :  { %68 = vadd.xlane.f32.xlu0 %v59_v2  ;;  %p153_p4 = pnand %p151_p3, %p148_p2 }
  0xb5   :  { %v69_v3 = vpop.xlane.xlu0 %68 }
  0xb6   :  { %v70_v4 = vrot.slane %v69_v3, 4 }
  0xb8   :  { %v71_v5 = vadd.f32 %v70_v4, %v69_v3 }
  0xba   :  { %v72_v6 = vrot.slane %v71_v5, 2 }
  0xbc   :  { %v73_v7 = vadd.f32 %v72_v6, %v71_v5 }
  0xbe   :  { %v74_v8 = vrot.slane %v73_v7, 1 }
  0xc0   :  { %v75_v9 = vadd.f32 %v74_v8, %v73_v7 }
  0xc2   :  { %98 = vpush %v75_v9 }
  0xf3   :  { %s99_s4 = spop %98 }
  0xf4   :  { %78 = sst [smem:[#allocation8]] %s99_s4 }
  0xf5   :  { %156 = shalt.err (!%p153_p4)
}
  0xf6   :  { %s165_s11 = smov [#allocation8]  }
  0xf7   :  { %86 = dma.smem_to_hbm %s165_s11, 16, %s219_s2, [#allocation5]  }
  0xf8   :  { %161 = dma.done.wait [#allocation5], 16  }
  0xf9   :  { %162 = vsyncadd [#allocation5], 4294967280 }
  0xfa   :  { %90 = sfence }
  0xfb   :  { %91 = vsyncpa [#allocation4], 1 }
  0xfc   :  { %92 = vsyncpa [#allocation7], 1 }
  0xfd   :  { %93 = vsyncpa [#allocation5], 1 }

</bundles_post_ra>
